<compile_context>
chip_gen: v5e
topology: v5e:2x2
jax: 0.10.0
libtpu: 0.0.40
codegen_flags: <defaults>
</compile_context>

<pallas_src>
import functools
import math

import jax
import jax.numpy as jnp
from jax import lax
from jax.experimental import pallas as pl
from jax.experimental.pallas import tpu as pltpu


def _normalize_kernel(x_ref, gain_ref, bias_ref, o_ref, *, feat, segments, epsilon):
    """Normalize each length-`feat` segment of the last axis independently.

    x_ref:    (row_tile, segments*feat) block
    gain_ref: (1, segments*feat) f32 (gain tiled `segments` times), resident across steps
    bias_ref: (1, segments*feat) f32, resident across steps
    """
    x = x_ref[...].astype(jnp.float32)
    eps = jnp.float32(epsilon)
    inv_n = jnp.float32(1.0 / feat)
    inv_nm1 = jnp.float32(1.0 / (feat - 1))       # torch.var default: unbiased (N-1)

    if segments == 1:
        # Plain per-row path (feat >= 128, or rows not divisible by the fold factor).
        mu = jnp.mean(x, axis=-1, keepdims=True)
        diff = x - mu
        var = jnp.sum(diff * diff, axis=-1, keepdims=True) * inv_nm1
        sigma = jnp.sqrt(var + eps)
        # Per-row reciprocal on the (tile, 1) column then broadcast multiplies; avoids a
        # full-tile divide.  Not bit-identical to division (two roundings), well < 1e-5.
        inv = pl.reciprocal(sigma + eps, approx=False)
        out = (diff * inv) * gain_ref[...] + bias_ref[...]
    else:
        # Lane-dense path: each super-row holds `segments` independent length-`feat` rows.
        k = segments
        kf = k * feat
        # Block-diagonal 0/1 matrices for segmented reduce / broadcast on the idle MXU.
        # Built with 2-D iota + compares (no integer division, which the VPU lacks).
        i_idx = lax.broadcasted_iota(jnp.int32, (kf, k), 0)
        j_idx = lax.broadcasted_iota(jnp.int32, (kf, k), 1)
        sum_mat = ((i_idx >= j_idx * feat) &
                   (i_idx < (j_idx + 1) * feat)).astype(jnp.float32)      # (kf, k)
        r_idx = lax.broadcasted_iota(jnp.int32, (k, kf), 0)
        c_idx = lax.broadcasted_iota(jnp.int32, (k, kf), 1)
        bcast_mat = ((c_idx >= r_idx * feat) &
                     (c_idx < (r_idx + 1) * feat)).astype(jnp.float32)    # (k, kf)

        dot = functools.partial(jnp.dot, preferred_element_type=jnp.float32,
                                precision=lax.Precision.HIGHEST)
        mu = dot(x, sum_mat) * inv_n                     # (tile, k) per-segment means
        mu_full = dot(mu, bcast_mat)                     # (tile, kf) broadcast back
        diff = x - mu_full
        var = dot(diff * diff, sum_mat) * inv_nm1        # (tile, k) unbiased variance
        sigma = jnp.sqrt(var + eps)
        inv = pl.reciprocal(sigma + eps, approx=False)   # (tile, k)
        inv_full = dot(inv, bcast_mat)                   # (tile, kf)
        out = (diff * inv_full) * gain_ref[...] + bias_ref[...]

    o_ref[...] = out.astype(o_ref.dtype)


def _vmem_config():
    # Generation-aware VMEM sizing: v5e/v6e have 128 MiB per core, v7x only 64 MiB.
    try:
        cap = int(pltpu.get_tpu_info().vmem_capacity_bytes)
    except Exception:                      # no info available -> assume smallest (v7x)
        cap = 64 * 1024 * 1024
    limit = min(int(cap * 0.7), 80 * 1024 * 1024)   # ~44 MiB on v7x, 80 MiB on v5e/v6e
    tile_budget = limit // 2                         # headroom for Mosaic scratch/temps
    return limit, tile_budget


def _choose_row_tile(rows, feat, dtype_bytes, vmem_tile_budget_bytes,
                     target_step_bytes=4 * 1024 * 1024):
    # Sublane packing multiple for the input dtype: 8 (f32), 16 (bf16/f16), 32 (int8).
    packing = max(8, 32 // max(dtype_bytes, 1))
    # Per-row VMEM cost: double-buffered input + output tiles (input dtype) plus
    # ~12 B/elem of f32 working copies (upcast x, diff, pre-cast output) in the body.
    per_row_bytes = feat * (4 * dtype_bytes + 12)
    row_tile = max(packing, vmem_tile_budget_bytes // per_row_bytes)
    # Byte-based step cap (not a fixed row count): each step should move a few MiB of
    # input so DMA time dominates the ~0.35us fixed grid-step overhead even for small feat.
    row_tile = min(row_tile, max(packing, target_step_bytes // (feat * dtype_bytes)))
    # No point in a block larger than the whole (packing-rounded) array.
    row_tile = min(row_tile, ((rows + packing - 1) // packing) * packing)
    # Aim for >= 4 near-equal steps when rows allow: >= 2 blocks per v7x TensorCore keeps
    # per-core DMA/compute overlap and a balanced megacore split.
    if rows >= 4 * packing:
        quarter = (((rows + 3) // 4 + packing - 1) // packing) * packing
        row_tile = min(row_tile, quarter)
    return max((row_tile // packing) * packing, packing)


def normalize_pallas(x, gain, bias, epsilon=1e-6, row_tile=None, lane_dense=True):
    """LayerNorm-style normalization over the last axis (PyTorch `Normalize`, dim=-1)."""
    orig_shape = x.shape
    feat = orig_shape[-1]
    assert gain.shape == (feat,) and bias.shape == (feat,)
    # torch.var(unbiased=True) on a single element is NaN; fail loudly instead.
    assert feat >= 2, "Normalize needs features >= 2 (unbiased variance)"

    x2d = x.reshape(-1, feat)
    rows = x2d.shape[0]
    dtype_bytes = jnp.dtype(x.dtype).itemsize

    # Lane-dense folding for narrow feature dims: fold k rows into the 128-wide lane axis
    # so every vector store is a full (unmasked) vst rather than a masked partial store.
    segments = 1
    if lane_dense and feat < 128 and rows > 0:
        k = 128 // math.gcd(feat, 128)        # smallest k with (k*feat) % 128 == 0
        if 2 <= k <= 64 and rows % k == 0:
            segments = k
    eff_feat = segments * feat
    eff_rows = rows // segments
    x2d = x2d.reshape(eff_rows, eff_feat)     # contiguous merge: free, no HBM copy

    vmem_limit, tile_budget = _vmem_config()
    if row_tile is None:
        row_tile = _choose_row_tile(eff_rows, eff_feat, dtype_bytes, tile_budget)

    grid = pl.cdiv(eff_rows, row_tile)        # ragged last block handled by Pallas

    # Cast / tile parameters once on the host side; constant block index keeps the
    # (1, eff_feat) f32 blocks resident across all grid steps.
    gain_row = jnp.tile(gain.astype(jnp.float32), segments).reshape(1, eff_feat)
    bias_row = jnp.tile(bias.astype(jnp.float32), segments).reshape(1, eff_feat)

    kernel = functools.partial(_normalize_kernel, feat=feat, segments=segments,
                               epsilon=float(epsilon))

    out2d = pl.pallas_call(
        kernel,
        out_shape=jax.ShapeDtypeStruct((eff_rows, eff_feat), x.dtype),
        grid_spec=pltpu.PrefetchScalarGridSpec(
            num_scalar_prefetch=0,
            grid=(grid,),
            in_specs=[
                pl.BlockSpec((row_tile, eff_feat), lambda i: (i, 0)),
                pl.BlockSpec((1, eff_feat), lambda i: (0, 0)),
                pl.BlockSpec((1, eff_feat), lambda i: (0, 0)),
            ],
            out_specs=pl.BlockSpec((row_tile, eff_feat), lambda i: (i, 0)),
        ),
        compiler_params=pltpu.CompilerParams(
            dimension_semantics=("parallel",),
            vmem_limit_bytes=vmem_limit,
        ),
    )(x2d, gain_row, bias_row)

    return out2d.reshape(orig_shape)
    # TODO(synk): forward(dim != -1) path of the PyTorch module is not implemented;
    # callers should move the normalized axis to the end before calling this wrapper.


def normalize_ref(x, gain, bias, epsilon=1e-6):
    """Pure-JAX reference mirroring the PyTorch forward (dim=-1)."""
    xf = x.astype(jnp.float32)
    mu = jnp.mean(xf, axis=-1, keepdims=True)
    var = jnp.var(xf, axis=-1, keepdims=True, ddof=1)   # unbiased, like torch.var
    sigma = jnp.sqrt(var + epsilon)
    return (gain * (xf - mu) / (sigma + epsilon) + bias).astype(x.dtype)


if __name__ == "__main__":
    key = jax.random.PRNGKey(0)
    k0, k1, k2, k3, k4 = jax.random.split(key, 5)

    F = 32
    # Deterministic parameter init matching nn.Parameter(torch.ones/zeros(features)).
    gain = jnp.ones((F,), dtype=jnp.float32)
    bias = jnp.zeros((F,), dtype=jnp.float32)

    # Case 1: module-default small shape (batch=2, seq=8, hidden=32) -> lane-dense path.
    x = jax.random.normal(k0, (2, 8, F), dtype=jnp.float32)
    out = normalize_pallas(x, gain, bias, epsilon=1e-6)
    jax.block_until_ready(out)
    exp = normalize_ref(x, gain, bias, epsilon=1e-6)
    assert out.shape == x.shape
    assert jnp.allclose(out, exp, atol=1e-5, rtol=1e-5), "mismatch vs reference (lane-dense)"

    # Case 2: rows not divisible by the fold factor -> plain per-row path + ragged last block.
    x2 = jax.random.normal(k1, (3, 13, F), dtype=jnp.float32) * 2.0 + 0.5
    out2 = normalize_pallas(x2, gain, bias, epsilon=1e-6)
    jax.block_until_ready(out2)
    exp2 = normalize_ref(x2, gain, bias, epsilon=1e-6)
    assert out2.shape == x2.shape
    assert jnp.allclose(out2, exp2, atol=1e-5, rtol=1e-5), "mismatch vs reference (ragged/plain)"

    # Case 3: multi-step grid through the lane-dense path, non-trivial gain/bias.
    gain3 = jax.random.normal(k2, (F,), dtype=jnp.float32) * 0.5 + 1.0
    bias3 = jax.random.normal(k3, (F,), dtype=jnp.float32) * 0.1
    x3 = jax.random.normal(k4, (4, 128, F), dtype=jnp.float32) * 0.7 - 1.3
    out3 = normalize_pallas(x3, gain3, bias3, epsilon=1e-6)
    jax.block_until_ready(out3)
    exp3 = normalize_ref(x3, gain3, bias3, epsilon=1e-6)
    assert out3.shape == x3.shape
    assert jnp.allclose(out3, exp3, atol=1e-5, rtol=1e-5), "mismatch vs reference (multi-block)"

    print("KERNEL_OK")
</pallas_src>

<mosaic_0001>
module attributes {stable_mosaic.version = 11 : i64} {
  func.func @_normalize_kernel(%arg0: i32, %arg1: memref<8x128xf32, #tpu.memory_space<vmem>>, %arg2: memref<1x128xf32, #tpu.memory_space<vmem>>, %arg3: memref<1x128xf32, #tpu.memory_space<vmem>>, %arg4: memref<8x128xf32, #tpu.memory_space<vmem>>) attributes {dimension_semantics = [#tpu.dimension_semantics<parallel>], iteration_bounds = array<i64: 1>, scalar_prefetch = 0 : i64, scratch_operands = 0 : i64, tpu.core_type = #tpu.core_type<tc>, window_params = [{transform_indices = @transform_0, window_bounds = array<i64: 8, 128>}, {pipeline_mode = #tpu.pipeline_mode<synchronous>, transform_indices = @transform_1, window_bounds = array<i64: 1, 128>}, {pipeline_mode = #tpu.pipeline_mode<synchronous>, transform_indices = @transform_2, window_bounds = array<i64: 1, 128>}, {transform_indices = @transform_3, window_bounds = array<i64: 8, 128>}]} {
    %c0 = arith.constant 0 : index
    %c0_0 = arith.constant 0 : index
    %0 = vector.load %arg1[%c0, %c0_0] : memref<8x128xf32, #tpu.memory_space<vmem>>, vector<8x128xf32>
    %1 = tpu.iota {dimensions = array<i32: 0>} : vector<128x4xi32>
    %2 = tpu.iota {dimensions = array<i32: 1>} : vector<128x4xi32>
    %c32_i32 = arith.constant 32 : i32
    %3 = vector.broadcast %c32_i32 : i32 to vector<128x4xi32>
    %4 = arith.muli %2, %3 : vector<128x4xi32>
    %5 = arith.cmpi sge, %1, %4 : vector<128x4xi32>
    %c1_i32 = arith.constant 1 : i32
    %6 = vector.broadcast %c1_i32 : i32 to vector<128x4xi32>
    %7 = arith.addi %2, %6 : vector<128x4xi32>
    %c32_i32_1 = arith.constant 32 : i32
    %8 = vector.broadcast %c32_i32_1 : i32 to vector<128x4xi32>
    %9 = arith.muli %7, %8 : vector<128x4xi32>
    %10 = arith.cmpi slt, %1, %9 : vector<128x4xi32>
    %11 = arith.andi %5, %10 : vector<128x4xi1>
    %12 = arith.extui %11 : vector<128x4xi1> to vector<128x4xi32>
    %13 = arith.sitofp %12 : vector<128x4xi32> to vector<128x4xf32>
    %14 = tpu.iota {dimensions = array<i32: 0>} : vector<4x128xi32>
    %15 = tpu.iota {dimensions = array<i32: 1>} : vector<4x128xi32>
    %c32_i32_2 = arith.constant 32 : i32
    %16 = vector.broadcast %c32_i32_2 : i32 to vector<4x128xi32>
    %17 = arith.muli %14, %16 : vector<4x128xi32>
    %18 = arith.cmpi sge, %15, %17 : vector<4x128xi32>
    %c1_i32_3 = arith.constant 1 : i32
    %19 = vector.broadcast %c1_i32_3 : i32 to vector<4x128xi32>
    %20 = arith.addi %14, %19 : vector<4x128xi32>
    %c32_i32_4 = arith.constant 32 : i32
    %21 = vector.broadcast %c32_i32_4 : i32 to vector<4x128xi32>
    %22 = arith.muli %20, %21 : vector<4x128xi32>
    %23 = arith.cmpi slt, %15, %22 : vector<4x128xi32>
    %24 = arith.andi %18, %23 : vector<4x128xi1>
    %25 = arith.extui %24 : vector<4x128xi1> to vector<4x128xi32>
    %26 = arith.sitofp %25 : vector<4x128xi32> to vector<4x128xf32>
    %cst = arith.constant dense<0.000000e+00> : vector<8x4xf32>
    %27 = tpu.matmul %0, %13, %cst {dimension_numbers = #tpu.dot_dimension_numbers<[1], [0], [0], [1], [0, 0, 1, 1], [], []>, precision = #tpu.contract_precision<fp32>} : vector<8x128xf32>, vector<128x4xf32>, vector<8x4xf32> -> vector<8x4xf32>
    %cst_5 = arith.constant 3.125000e-02 : f32
    %28 = vector.broadcast %cst_5 : f32 to vector<8x4xf32>
    %29 = arith.mulf %27, %28 : vector<8x4xf32>
    %cst_6 = arith.constant dense<0.000000e+00> : vector<8x128xf32>
    %30 = tpu.matmul %29, %26, %cst_6 {dimension_numbers = #tpu.dot_dimension_numbers<[1], [0], [0], [1], [0, 0, 1, 1], [], []>, precision = #tpu.contract_precision<fp32>} : vector<8x4xf32>, vector<4x128xf32>, vector<8x128xf32> -> vector<8x128xf32>
    %31 = arith.subf %0, %30 : vector<8x128xf32>
    %32 = arith.mulf %31, %31 : vector<8x128xf32>
    %cst_7 = arith.constant dense<0.000000e+00> : vector<8x4xf32>
    %33 = tpu.matmul %32, %13, %cst_7 {dimension_numbers = #tpu.dot_dimension_numbers<[1], [0], [0], [1], [0, 0, 1, 1], [], []>, precision = #tpu.contract_precision<fp32>} : vector<8x128xf32>, vector<128x4xf32>, vector<8x4xf32> -> vector<8x4xf32>
    %cst_8 = arith.constant 0.0322580636 : f32
    %34 = vector.broadcast %cst_8 : f32 to vector<8x4xf32>
    %35 = arith.mulf %33, %34 : vector<8x4xf32>
    %cst_9 = arith.constant 9.99999997E-7 : f32
    %36 = vector.broadcast %cst_9 : f32 to vector<8x4xf32>
    %37 = arith.addf %35, %36 : vector<8x4xf32>
    %38 = math.sqrt %37 : vector<8x4xf32>
    %cst_10 = arith.constant 9.99999997E-7 : f32
    %39 = vector.broadcast %cst_10 : f32 to vector<8x4xf32>
    %40 = arith.addf %38, %39 : vector<8x4xf32>
    %41 = tpu.reciprocal %40 : vector<8x4xf32> -> vector<8x4xf32>
    %cst_11 = arith.constant dense<0.000000e+00> : vector<8x128xf32>
    %42 = tpu.matmul %41, %26, %cst_11 {dimension_numbers = #tpu.dot_dimension_numbers<[1], [0], [0], [1], [0, 0, 1, 1], [], []>, precision = #tpu.contract_precision<fp32>} : vector<8x4xf32>, vector<4x128xf32>, vector<8x128xf32> -> vector<8x128xf32>
    %43 = arith.mulf %31, %42 : vector<8x128xf32>
    %c0_12 = arith.constant 0 : index
    %c0_13 = arith.constant 0 : index
    %44 = vector.load %arg2[%c0_12, %c0_13] : memref<1x128xf32, #tpu.memory_space<vmem>>, vector<1x128xf32>
    %45 = vector.broadcast %44 : vector<1x128xf32> to vector<8x128xf32>
    %46 = arith.mulf %43, %45 : vector<8x128xf32>
    %c0_14 = arith.constant 0 : index
    %c0_15 = arith.constant 0 : index
    %47 = vector.load %arg3[%c0_14, %c0_15] : memref<1x128xf32, #tpu.memory_space<vmem>>, vector<1x128xf32>
    %48 = vector.broadcast %47 : vector<1x128xf32> to vector<8x128xf32>
    %49 = arith.addf %46, %48 : vector<8x128xf32>
    %c0_16 = arith.constant 0 : index
    %c0_17 = arith.constant 0 : index
    %50 = vector.load %arg4[%c0_16, %c0_17] : memref<8x128xf32, #tpu.memory_space<vmem>>, vector<8x128xf32>
    tpu.vector_store %arg4[%c0_16, %c0_17], %49 {strides = array<i32>} : memref<8x128xf32, #tpu.memory_space<vmem>>, vector<8x128xf32>,
    return
  }
  func.func @transform_0(%arg0: i32) -> (i32, i32) {
    %c0_i32 = arith.constant 0 : i32
    %c0_i32_0 = arith.constant 0 : i32
    return %arg0, %c0_i32 : i32, i32
  }
  func.func @transform_1(%arg0: i32) -> (i32, i32) {
    %c0_i32 = arith.constant 0 : i32
    %c0_i32_0 = arith.constant 0 : i32
    %c0_i32_1 = arith.constant 0 : i32
    return %c0_i32, %c0_i32_0 : i32, i32
  }
  func.func @transform_2(%arg0: i32) -> (i32, i32) {
    %c0_i32 = arith.constant 0 : i32
    %c0_i32_0 = arith.constant 0 : i32
    %c0_i32_1 = arith.constant 0 : i32
    return %c0_i32, %c0_i32_0 : i32, i32
  }
  func.func @transform_3(%arg0: i32) -> (i32, i32) {
    %c0_i32 = arith.constant 0 : i32
    %c0_i32_0 = arith.constant 0 : i32
    return %arg0, %c0_i32 : i32, i32
  }
}

</mosaic_0001>

<bundles_post_ra>
// kernel: tpu_custom_call.1
= control target key start
LH: loop header
LB: loop body
LE: loop exit
PB: predicated region body
PF: predicated region fallthrough
CT: control target
= control target key end

     0   :  { %8 = vsyncpa [#allocation3], 0  ;;  %s2250_s0 = inlined_call_operand.hbm [shape: f32[4,128], index: 0, kind: input, shape index: {}]   ;;  %s2251_s1 = inlined_call_operand.hbm [shape: f32[1,128], index: 1, kind: input, shape index: {}]   ;;  %s2252_s2 = inlined_call_operand.vmem [shape: f32[1,128], index: 2, kind: input, shape index: {}]   ;;  %s2253_s3 = inlined_call_operand.hbm [shape: f32[4,128], index: 3, kind: output, shape index: {}]  }
   0x1   :  { %9 = vsyncpa [#allocation6], 0 }
   0x2   :  { %10 = vsyncpa [#allocation4], 0 }
   0x3   :  { %14 = vsyncadd [#allocation3], 64  ;;  %s15_s14 = sshll.u32 %s2250_s0, 4  ;;  %s1415_s15 = smov [#allocation2]   ;;  %s16_s14 = int_to_ptr.hbm [resolvable:$true] %s15_s14 }
   0x4   :  { %s17_s16 = sshll.u32 %s1415_s15, 4  ;;  %s29_s19 = sshll.u32 %s2251_s1, 4  ;;  %s18_s16 = int_to_ptr.vmem [resolvable:$true] %s17_s16  ;;  %s30_s19 = int_to_ptr.hbm [resolvable:$true] %s29_s19 }
   0x5   :  { %s1416_s20 = smov 64   ;;  %s1417_s21 = smov 4  }
   0x6   :  { %23 = dma.hbm_to_vmem [thread:$0]  %s16_s14, 64, %s18_s16, [#allocation3], %s1416_s20, %s1416_s20, %s1417_s21  }
   0x7   :  { %s1418_s22 = smov [#allocation5]  }
   0x8   :  { %s31_s23 = sshll.u32 %s1418_s22, 4  ;;  %s32_s23 = int_to_ptr.vmem [resolvable:$true] %s31_s23 }
   0x9   :  { %34 = dma.hbm_to_vmem [thread:$0]  %s30_s19, 16, %s32_s23, [#allocation6]  }
   0xa   :  { %1409 = dma.done.wait [#allocation3], 128  }
   0xb   :  { %1410 = vsyncadd [#allocation3], 4294967168  ;;  %v46_v0 = vlaneseq }
   0xc   :  { %1411 = dma.done.wait [#allocation6], 16  }
   0xd   :  { %1412 = vsyncadd [#allocation6], 4294967280  ;;  %v1451_v1 = vshrl.u32 %v46_v0, 7  ;;  %v1453_v2 = vand.u32 127, %v46_v0  ;;  %v1419_v14 = vmov 1.0   ;;  %v2260_v16 = vmov 0.0  }
   0xe   :  { %v2294_v49 = vmov 0  ;;  %v2298_v56 = vmov 0 }
   0xf   :  { %v62_v3 = vadd.s32 120, %v1451_v1  ;;  %v1457_v4 = vmul.u32 32, %v1453_v2  ;;  %v82_v5 = vadd.s32 1, %v1453_v2  ;;  %v61_v6 = vadd.s32 112, %v1451_v1 }
  0x10   :  { %v60_v7 = vadd.s32 104, %v1451_v1  ;;  %v59_v8 = vadd.s32 96, %v1451_v1  ;;  %v58_v9 = vadd.s32 88, %v1451_v1  ;;  %v57_v10 = vadd.s32 80, %v1451_v1 }
  0x11   :  { %vm81_vm0 = vcmp.ge.s32.totalorder %v62_v3, %v1457_v4  ;;  %v1466_v11 = vmul.u32 32, %v82_v5  ;;  %vm80_vm1 = vcmp.ge.s32.totalorder %v61_v6, %v1457_v4  ;;  %v56_v12 = vadd.s32 72, %v1451_v1 }
  0x12   :  { %vm79_vm2 = vcmp.ge.s32.totalorder %v60_v7, %v1457_v4  ;;  %vm78_vm3 = vcmp.ge.s32.totalorder %v59_v8, %v1457_v4  ;;  %vm77_vm4 = vcmp.ge.s32.totalorder %v58_v9, %v1457_v4  ;;  %vm76_vm5 = vcmp.ge.s32.totalorder %v57_v10, %v1457_v4 }
  0x13   :  { %vm99_vm6 = vcmp.lt.s32.totalorder %v62_v3, %v1466_v11  ;;  %vm98_vm7 = vcmp.lt.s32.totalorder %v61_v6, %v1466_v11  ;;  %vm97_vm8 = vcmp.lt.s32.totalorder %v60_v7, %v1466_v11  ;;  %vm96_vm9 = vcmp.lt.s32.totalorder %v59_v8, %v1466_v11 }
  0x14   :  { %vm1478_vm10 = vmand %vm81_vm0, %vm99_vm6  ;;  %vm95_vm11 = vcmp.lt.s32.totalorder %v58_v9, %v1466_v11  ;;  %vm94_vm12 = vcmp.lt.s32.totalorder %v57_v10, %v1466_v11  ;;  %vm75_vm13 = vcmp.ge.s32.totalorder %v56_v12, %v1457_v4  ;;  %vm93_vm14 = vcmp.lt.s32.totalorder %v56_v12, %v1466_v11 }
  0x15   :  { %1222 = vmatpush.msk.msra.mxu0 %vm1478_vm10, %v1419_v14  ;;  %vm1491_vm15 = vmand %vm80_vm1, %vm98_vm7  ;;  %v1220_v17 = vsel %vm1478_vm10, 1.0, %v2260_v16  ;;  %v55_v18 = vadd.s32 64, %v1451_v1  ;;  %v54_v19 = vadd.s32 56, %v1451_v1  ;;  %v53_v20 = vadd.s32 48, %v1451_v1  ;;  %1238 = vmatpush.msk.msra.mxu3 %vm1478_vm10, %v1419_v14 }
  0x16   :  { %vm1508_vm0 = vmand %vm79_vm2, %vm97_vm8  ;;  %v1512_v22 = vsub.f32 %v1220_v17, %v1220_v17  ;;  %v1219_v23 = vsel %vm1491_vm15, 1.0, %v2260_v16  ;;  %v1518_v24 = vadd.s32 40, %v1451_v1  ;;  %v1521_v25 = vadd.s32 32, %v1451_v1 }
  0x17   :  { %1223 = vmatpush.msk.msra.mxu0 %vm1491_vm15, %v1419_v14  ;;  %vm1530_vm1 = vmand %vm78_vm3, %vm96_vm9  ;;  %v1534_v27 = vsub.f32 %v1219_v23, %v1219_v23  ;;  %v1218_v28 = vsel %vm1508_vm0, 1.0, %v2260_v16  ;;  %vm74_vm2 = vcmp.ge.s32.totalorder %v55_v18, %v1457_v4  ;;  %vm92_vm6 = vcmp.lt.s32.totalorder %v55_v18, %v1466_v11  ;;  %1239 = vmatpush.msk.msra.mxu3 %vm1491_vm15, %v1419_v14 }
  0x18   :  { %v1545_v29 = vand.u32 4294901760, %v1512_v22  ;;  %vm1551_vm3 = vmand %vm77_vm4, %vm95_vm11  ;;  %v1555_v31 = vsub.f32 %v1218_v28, %v1218_v28  ;;  %v1217_v32 = vsel %vm1530_vm1, 1.0, %v2260_v16  ;;  %vm73_vm7 = vcmp.ge.s32.totalorder %v54_v19, %v1457_v4  ;;  %300 = vmatpush.msra.mxu2 %v1512_v22 }
  0x19   :  { %1224 = vmatpush.msk.msra.mxu0 %vm1508_vm0, %v1419_v14  ;;  %v1566_v33 = vand.u32 4294901760, %v1534_v27  ;;  %vm1572_vm4 = vmand %vm76_vm5, %vm94_vm12  ;;  %v1576_v35 = vsub.f32 %v1217_v32, %v1217_v32  ;;  %v1216_v36 = vsel %vm1551_vm3, 1.0, %v2260_v16  ;;  %vm91_vm8 = vcmp.lt.s32.totalorder %v54_v19, %v1466_v11  ;;  %1240 = vmatpush.msk.msra.mxu3 %vm1508_vm0, %v1419_v14 }
  0x1a   :  { %v200_v37 = vsub.f32 %v1512_v22, %v1545_v29  ;;  %v1588_v38 = vand.u32 4294901760, %v1555_v31  ;;  %vm1594_vm5 = vmand %vm75_vm13, %vm93_vm14  ;;  %v1598_v40 = vsub.f32 %v1216_v36, %v1216_v36  ;;  %v1215_v41 = vsel %vm1572_vm4, 1.0, %v2260_v16  ;;  %303 = vmatpush.msra.mxu2 %v1534_v27 }
  0x1b   :  { %1225 = vmatpush.msk.msra.mxu0 %vm1530_vm1, %v1419_v14  ;;  %v206_v42 = vsub.f32 %v1534_v27, %v1566_v33  ;;  %v1610_v43 = vand.u32 4294901760, %v1576_v35  ;;  %v1612_v44 = vsub.f32 %v1215_v41, %v1215_v41  ;;  %v1214_v45 = vsel %vm1594_vm5, 1.0, %v2260_v16  ;;  %1241 = vmatpush.msk.msra.mxu3 %vm1530_vm1, %v1419_v14  ;;  %vm1631_vm9 = vmand %vm74_vm2, %vm92_vm6 }
  0x1c   :  { %v1620_v46 = vand.u32 4294901760, %v200_v37  ;;  %v212_v47 = vsub.f32 %v1555_v31, %v1588_v38  ;;  %v1625_v48 = vand.u32 4294901760, %v1598_v40  ;;  %v2295_v49 = vsel %vm1631_vm9, 4294967295, %v2294_v49  ;;  %306 = vmatpush.msra.mxu2 %v1555_v31  ;;  %vm1661_vm12 = vmand %vm73_vm7, %vm91_vm8 }
  0x1d   :  { %v1635_v50 = vsub.f32 %v1214_v45, %v1214_v45  ;;  %v1638_v51 = vand.u32 4294901760, %v206_v42  ;;  %1226 = vmatpush.msk.msra.mxu0 %vm1551_vm3, %v1419_v14  ;;  %v218_v52 = vsub.f32 %v1576_v35, %v1610_v43  ;;  %v1646_v53 = vand.u32 4294901760, %v1612_v44  ;;  %1242 = vmatpush.msk.msra.mxu3 %vm1551_vm3, %v1419_v14 }
  0x1e   :  { %vm72_vm11 = vcmp.ge.s32.totalorder %v53_v20, %v1457_v4  ;;  %202 = vmatpush.msra.mxu1 %v1620_v46  ;;  %v1653_v54 = vand.u32 4294901760, %v212_v47  ;;  %v224_v55 = vsub.f32 %v1598_v40, %v1625_v48  ;;  %v2299_v56 = vsel %vm1661_vm12, 4294967295, %v2298_v56  ;;  %309 = vmatpush.msra.mxu2 %v1576_v35 }
  0x1f   :  { %2296 = vst [vmem:[#allocation11_spill] sm:$0xff] %v1638_v51  ;;  %v1666_v57 = vand.u32 4294901760, %v1635_v50  ;;  %vm90_vm13 = vcmp.lt.s32.totalorder %v53_v20, %v1466_v11  ;;  %1227 = vmatpush.msk.msra.mxu0 %vm1572_vm4, %v1419_v14  ;;  %v230_v58 = vsub.f32 %v1612_v44, %v1646_v53  ;;  %v1213_v60 = vsel %vm1631_vm9, 1.0, %v2260_v16  ;;  %1243 = vmatpush.msk.msra.mxu3 %vm1572_vm4, %v1419_v14 }
  0x20   :  { %2297 = vst [vmem:[#allocation12_spill] sm:$0xff] %v1653_v54  ;;  %vm1675_vm14 = vmand %vm72_vm11, %vm90_vm13  ;;  %vm71_vm2 = vcmp.ge.s32.totalorder %v1518_v24, %v1457_v4  ;;  %208 = vmatpush.msra.mxu1 %v1638_v51  ;;  %v1688_v61 = vand.u32 4294901760, %v218_v52  ;;  %v1690_v62 = vand.u32 4294901760, %v224_v55  ;;  %v1692_v63 = vsub.f32 %v1213_v60, %v1213_v60  ;;  %312 = vmatpush.msra.mxu2 %v1598_v40 }
  0x21   :  { %vm89_vm6 = vcmp.lt.s32.totalorder %v1518_v24, %v1466_v11  ;;  %1228 = vmatpush.msk.msra.mxu0 %vm1594_vm5, %v1419_v14  ;;  %v236_v0 = vsub.f32 %v1635_v50, %v1666_v57  ;;  %v2304_v3 = vmov 0  ;;  %v1212_v5 = vsel %vm1661_vm12, 1.0, %v2260_v16  ;;  %1244 = vmatpush.msk.msra.mxu3 %vm1594_vm5, %v1419_v14 }
  0x22   :  { %2302 = vst [vmem:[#allocation13_spill] sm:$0xff] %v1688_v61  ;;  %vm1702_vm7 = vmand %vm71_vm2, %vm89_vm6  ;;  %vm70_vm8 = vcmp.ge.s32.totalorder %v1521_v25, %v1457_v4  ;;  %vm88_vm11 = vcmp.lt.s32.totalorder %v1521_v25, %v1466_v11  ;;  %214 = vmatpush.msra.mxu1 %v1653_v54  ;;  %v1717_v6 = vand.u32 4294901760, %v230_v58  ;;  %v1720_v7 = vand.u32 4294901760, %v1692_v63  ;;  %315 = vmatpush.msra.mxu2 %v1612_v44 }
  0x23   :  { %2303 = vst [vmem:[#allocation14_spill] sm:$0xff] %v1690_v62  ;;  %v2305_v3 = vsel %vm1702_vm7, 4294967295, %v2304_v3  ;;  %v1722_v8 = vsub.f32 %v1212_v5, %v1212_v5  ;;  %vm1724_vm13 = vmand %vm70_vm8, %vm88_vm11  ;;  %v2307_v9 = vmov 0  ;;  %v1211_v10 = vsel %vm1675_vm14, 1.0, %v2260_v16  ;;  %1229 = vmatpush.msk.msra.mxu0 %vm1631_vm9, %v1419_v14  ;;  %1245 = vmatpush.msk.msra.mxu3 %vm1631_vm9, %v1419_v14 }
  0x24   :  { %2306 = vst [vmem:[#allocation15_spill] sm:$0xff] %v1717_v6  ;;  %v2308_v9 = vsel %vm1724_vm13, 4294967295, %v2307_v9  ;;  %v1735_v12 = vsub.f32 %v1211_v10, %v1211_v10  ;;  %v50_v17 = vadd.s32 24, %v1451_v1  ;;  %v1210_v18 = vsel %vm1702_vm7, 1.0, %v2260_v16  ;;  %220 = vmatpush.msra.mxu1 %v1688_v61  ;;  %318 = vmatpush.msra.mxu2 %v1635_v50 }
  0x25   :  { %v49_v19 = vadd.s32 16, %v1451_v1  ;;  %v242_v20 = vsub.f32 %v1692_v63, %v1720_v7  ;;  %v1749_v23 = vand.u32 4294901760, %v1722_v8  ;;  %v1751_v24 = vsub.f32 %v1210_v18, %v1210_v18  ;;  %1230 = vmatpush.msk.msra.mxu0 %vm1661_vm12, %v1419_v14  ;;  %1246 = vmatpush.msk.msra.mxu3 %vm1661_vm12, %v1419_v14 }
  0x26   :  { %v1209_v25 = vsel %vm1724_vm13, 1.0, %v2260_v16  ;;  %v1761_v28 = vand.u32 4294901760, %v1735_v12  ;;  %vm69_vm2 = vcmp.ge.s32.totalorder %v50_v17, %v1457_v4  ;;  %vm87_vm6 = vcmp.lt.s32.totalorder %v50_v17, %v1466_v11  ;;  %226 = vmatpush.msra.mxu1 %v1690_v62  ;;  %321 = vmatpush.msra.mxu2 %v1692_v63 }
  0x27   :  { %vm68_vm8 = vcmp.ge.s32.totalorder %v49_v19, %v1457_v4  ;;  %v1770_v32 = vand.u32 4294901760, %v236_v0  ;;  %v248_v36 = vsub.f32 %v1722_v8, %v1749_v23  ;;  %vm1774_vm11 = vmand %vm69_vm2, %vm87_vm6  ;;  %v2310_v37 = vmov 0  ;;  %1231 = vmatpush.msk.msra.mxu0 %vm1675_vm14, %v1419_v14  ;;  %1247 = vmatpush.msk.msra.mxu3 %vm1675_vm14, %v1419_v14  ;;  %v1809_v0 = vld [vmem:[#allocation2] sm:$0xff] }
  0x28   :  { %v2311_v37 = vsel %vm1774_vm11, 4294967295, %v2310_v37  ;;  %v1779_v41 = vand.u32 4294901760, %v1751_v24  ;;  %vm86_vm9 = vcmp.lt.s32.totalorder %v49_v19, %v1466_v11  ;;  %v2312_v42 = vmov 0  ;;  %232 = vmatpush.msra.mxu1 %v1717_v6  ;;  %324 = vmatpush.msra.mxu2 %v1722_v8  ;;  %2315 = vst [vmem:[#allocation18_spill] sm:$0xff] %v1809_v0 }
  0x29   :  { %2309 = vst [vmem:[#allocation16_spill] sm:$0xff] %v1770_v32  ;;  %vm1786_vm12 = vmand %vm68_vm8, %vm86_vm9  ;;  %v1790_v45 = vsub.f32 %v1209_v25, %v1209_v25  ;;  %v48_v47 = vadd.s32 8, %v1451_v1  ;;  %v1208_v52 = vsel %vm1774_vm11, 1.0, %v2260_v16  ;;  %v1800_v55 = vand.u32 4294901760, %v242_v20  ;;  %1232 = vmatpush.msk.msra.mxu0 %vm1702_vm7, %v1419_v14  ;;  %1248 = vmatpush.msk.msra.mxu3 %vm1702_vm7, %v1419_v14 }
  0x2a   :  { %v2313_v42 = vsel %vm1786_vm12, 4294967295, %v2312_v42  ;;  %v254_v58 = vsub.f32 %v1735_v12, %v1761_v28  ;;  %v1804_v60 = vsub.f32 %v1208_v52, %v1208_v52  ;;  %v1814_v5 = vand.u32 4294901760, %v248_v36  ;;  %238 = vmatpush.msra.mxu1 %v1770_v32  ;;  %327 = vmatpush.msra.mxu2 %v1735_v12 }
  0x2b   :  { %2314 = vst [vmem:[#allocation17_spill] sm:$0xff] %v1800_v55  ;;  %v1817_v10 = vand.u32 4294901760, %v1790_v45  ;;  %vm67_vm2 = vcmp.ge.s32.totalorder %v48_v47, %v1457_v4  ;;  %vm85_vm6 = vcmp.lt.s32.totalorder %v48_v47, %v1466_v11  ;;  %v260_v17 = vsub.f32 %v1751_v24, %v1779_v41  ;;  %1233 = vmatpush.msk.msra.mxu0 %vm1724_vm13, %v1419_v14 }
  0x2c   :  { %2316 = vst [vmem:[#allocation19_spill] sm:$0xff] %v1814_v5  ;;  %vm1827_vm8 = vmand %vm67_vm2, %vm85_vm6  ;;  %v1832_v19 = vand.u32 4294901760, %v1804_v60  ;;  %vm84_vm9 = vcmp.lt.s32.totalorder %v1451_v1, %v1466_v11  ;;  %v1207_v20 = vsel %vm1786_vm12, 1.0, %v2260_v16  ;;  %vm2319_vm2 = vcmp.ge.s32.totalorder %v1451_v1, %v1457_v4  ;;  %1249 = vmatpush.msk.msra.mxu3 %vm1724_vm13, %v1419_v14  ;;  %244 = vmatpush.msra.mxu1 %v1800_v55 }
  0x2d   :  { %vm1846_vm6 = vmand %vm2319_vm2, %vm84_vm9  ;;  %v1850_v36 = vsub.f32 %v1207_v20, %v1207_v20  ;;  %v1206_v11 = vsel %vm1827_vm8, 1.0, %v2260_v16  ;;  %v1859_v47 = vand.u32 4294901760, %v1809_v0  ;;  %v1862_v4 = vand.u32 4294901760, %v254_v58  ;;  %330 = vmatpush.msra.mxu2 %v1751_v24  ;;  %1234 = vmatpush.msk.msra.mxu0 %vm1774_vm11, %v1419_v14 }
  0x2e   :  { %v266_v52 = vsub.f32 %v1790_v45, %v1817_v10  ;;  %v1866_v20 = vsub.f32 %v1206_v11, %v1206_v11  ;;  %v1205_v32 = vsel %vm1846_vm6, 1.0, %v2260_v16  ;;  %1250 = vmatpush.msk.msra.mxu3 %vm1774_vm11, %v1419_v14  ;;  %250 = vmatpush.msra.mxu1 %v1814_v5  ;;  %v1886_v16 = vand.u32 4294901760, %v260_v17 }
  0x2f   :  { %2322 = vst [vmem:[#allocation20_spill] sm:$0xff] %v1862_v4  ;;  %v1876_v6 = vand.u32 4294901760, %v1850_v36  ;;  %v1878_v58 = vsub.f32 %v1205_v32, %v1205_v32  ;;  %v189_v11 = vsub.f32 %v1809_v0, %v1859_v47  ;;  %v272_v55 = vsub.f32 %v1804_v60, %v1832_v19  ;;  %333 = vmatpush.msra.mxu2 %v1790_v45 }
  0x30   :  { %2323 = vst [vmem:[#allocation21_spill] sm:$0xff] %v1886_v16  ;;  %v1891_v62 = vand.u32 4294901760, %v1866_v20  ;;  %1235 = vmatpush.msk.msra.mxu0 %vm1786_vm12, %v1419_v14  ;;  %1251 = vmatpush.msk.msra.mxu3 %vm1786_vm12, %v1419_v14  ;;  %v1901_v17 = vand.u32 4294901760, %v266_v52  ;;  %vm2324_vm9 = vnez %v2295_v49  ;;  %vm2325_vm2 = vnez %v2299_v56 }
  0x31   :  { %v190_v32 = vand.u32 4294901760, %v189_v11  ;;  %256 = vmatpush.msra.mxu1 %v1862_v4  ;;  %v278_v0 = vsub.f32 %v1850_v36, %v1876_v6  ;;  %v1906_v5 = vand.u32 4294901760, %v1878_v58  ;;  %336 = vmatpush.msra.mxu2 %v1804_v60  ;;  %v1916_v52 = vand.u32 4294901760, %v272_v55 }
  0x32   :  { %1236 = vmatpush.msk.msra.mxu0 %vm1827_vm8, %v1419_v14  ;;  %1252 = vmatpush.msk.msra.mxu3 %vm1827_vm8, %v1419_v14  ;;  %v284_v4 = vsub.f32 %v1866_v20, %v1891_v62 }
  0x33   :  { %v191_v61 = vsub.f32 %v189_v11, %v190_v32  ;;  %262 = vmatpush.msra.mxu1 %v1886_v16  ;;  %339 = vmatpush.msra.mxu2 %v1850_v36  ;;  %v1928_v51 = vand.u32 4294901760, %v278_v0  ;;  %v290_v55 = vsub.f32 %v1878_v58, %v1906_v5 }
  0x34   :  { %1237 = vmatpush.msk.msra.mxu0 %vm1846_vm6, %v1419_v14  ;;  %1253 = vmatpush.msk.msra.mxu3 %vm1846_vm6, %v1419_v14  ;;  %v1935_v16 = vand.u32 4294901760, %v284_v4 }
  0x35   :  { %v192_v54 = vand.u32 4294901760, %v191_v61  ;;  %268 = vmatpush.msra.mxu1 %v1901_v17  ;;  %342 = vmatpush.msra.mxu2 %v1866_v20  ;;  %v1940_v61 = vand.u32 4294901760, %v290_v55 }
  0x36   :  { %394 = vmatpush.msrb.mxu0 %v1545_v29  ;;  %387 = vmatmul.f32.vlgmr.msra.gmra.mxu3 %v190_v32 }
  0x37   :  { %193 = vmatmul.f32.vlgmr.msra.gmra.mxu0 %v192_v54  ;;  %274 = vmatpush.msra.mxu1 %v1916_v52 }
  0x38   :  { %398 = vmatpush.msrb.mxu0 %v1566_v33  ;;  %345 = vmatpush.msra.mxu2 %v1878_v58 }
  0x39   :  { %280 = vmatpush.msra.mxu1 %v1928_v51  ;;  %348 = vmatmul.f32.vlgmr.msra.gmra.mxu2 %v189_v11 }
  0x3a   :  { %402 = vmatpush.msrb.mxu0 %v1588_v38 }
  0x3b   :  { %286 = vmatpush.msra.mxu1 %v1935_v16 }
  0x3c   :  { %406 = vmatpush.msrb.mxu0 %v1610_v43 }
  0x3d   :  { %292 = vmatpush.msra.mxu1 %v1940_v61 }
  0x3e   :  { %410 = vmatpush.msrb.mxu0 %v1625_v48  ;;  %294 = vmatmul.f32.vlgmr.msra.gmra.mxu1 %v1859_v47 }
  0x3f   :  { %1254 = vmatpush.msk.msrb.mxu1 %vm1478_vm10, %v1419_v14 }
  0x40   :  { %414 = vmatpush.msrb.mxu0 %v1646_v53 }
  0x41   :  { %1255 = vmatpush.msk.msrb.mxu1 %vm1491_vm15, %v1419_v14 }
  0x42   :  { %418 = vmatpush.msrb.mxu0 %v1666_v57 }
  0x43   :  { %1256 = vmatpush.msk.msrb.mxu1 %vm1508_vm0, %v1419_v14 }
  0x44   :  { %422 = vmatpush.msrb.mxu0 %v1720_v7 }
  0x45   :  { %1257 = vmatpush.msk.msrb.mxu1 %vm1530_vm1, %v1419_v14 }
  0x46   :  { %426 = vmatpush.msrb.mxu0 %v1749_v23 }
  0x47   :  { %1258 = vmatpush.msk.msrb.mxu1 %vm1551_vm3, %v1419_v14 }
  0x48   :  { %430 = vmatpush.msrb.mxu0 %v1761_v28 }
  0x49   :  { %1259 = vmatpush.msk.msrb.mxu1 %vm1572_vm4, %v1419_v14 }
  0x4a   :  { %434 = vmatpush.msrb.mxu0 %v1779_v41 }
  0x4b   :  { %1260 = vmatpush.msk.msrb.mxu1 %vm1594_vm5, %v1419_v14 }
  0x4c   :  { %438 = vmatpush.msrb.mxu0 %v1817_v10 }
  0x4d   :  { %1261 = vmatpush.msk.msrb.mxu1 %vm2324_vm9, %v1419_v14 }
  0x4e   :  { %442 = vmatpush.msrb.mxu0 %v1832_v19 }
  0x4f   :  { %1262 = vmatpush.msk.msrb.mxu1 %vm2325_vm2, %v1419_v14 }
  0x50   :  { %446 = vmatpush.msrb.mxu0 %v1876_v6 }
  0x51   :  { %1263 = vmatpush.msk.msrb.mxu1 %vm1675_vm14, %v1419_v14 }
  0x52   :  { %450 = vmatpush.msrb.mxu0 %v1891_v62 }
  0x53   :  { %1264 = vmatpush.msk.msrb.mxu1 %vm1702_vm7, %v1419_v14 }
  0x54   :  { %454 = vmatpush.msrb.mxu0 %v1906_v5 }
  0x55   :  { %1265 = vmatpush.msk.msrb.mxu1 %vm1724_vm13, %v1419_v14  ;;  %456 = vmatmul.f32.vlgmr.msrb.gmra.mxu0 %v1859_v47 }
  0x56   :  { %798 = vmatpush.msra.mxu0 %v1512_v22  ;;  %v150_v22 = vadd.s32 1, %v1451_v1 }
  0x57   :  { %1266 = vmatpush.msk.msrb.mxu1 %vm1774_vm11, %v1419_v14 }
  0x58   :  { %801 = vmatpush.msra.mxu0 %v1534_v27  ;;  %v148_v27 = vmul.u32 32, %v1451_v1 }
  0x59   :  { %1267 = vmatpush.msk.msrb.mxu1 %vm1786_vm12, %v1419_v14 }
  0x5a   :  { %804 = vmatpush.msra.mxu0 %v1555_v31  ;;  %v151_v31 = vmul.u32 32, %v150_v22 }
  0x5b   :  { %1268 = vmatpush.msk.msrb.mxu1 %vm1827_vm8, %v1419_v14 }
  0x5c   :  { %807 = vmatpush.msra.mxu0 %v1576_v35  ;;  %v2326_v35 = vmov 0.0  }
  0x5d   :  { %1269 = vmatpush.msk.msrb.mxu1 %vm1846_vm6, %v1419_v14 }
  0x5e   :  { %493 = vmatmul.f32.vlgmr.msrb.gmra.mxu1 %v1859_v47  ;;  %810 = vmatpush.msra.mxu0 %v1598_v40 }
  0x5f   :  { %1289 = vmatpush.msk.msra.mxu1 %vm1478_vm10, %v1419_v14 }
  0x60   :  { %813 = vmatpush.msra.mxu0 %v1612_v44 }
  0x61   :  { %1290 = vmatpush.msk.msra.mxu1 %vm1491_vm15, %v1419_v14 }
  0x62   :  { %816 = vmatpush.msra.mxu0 %v1635_v50 }
  0x63   :  { %1291 = vmatpush.msk.msra.mxu1 %vm1508_vm0, %v1419_v14 }
  0x64   :  { %819 = vmatpush.msra.mxu0 %v1692_v63 }
  0x65   :  { %1292 = vmatpush.msk.msra.mxu1 %vm1530_vm1, %v1419_v14 }
  0x66   :  { %822 = vmatpush.msra.mxu0 %v1722_v8 }
  0x67   :  { %1293 = vmatpush.msk.msra.mxu1 %vm1551_vm3, %v1419_v14 }
  0x68   :  { %825 = vmatpush.msra.mxu0 %v1735_v12 }
  0x69   :  { %1294 = vmatpush.msk.msra.mxu1 %vm1572_vm4, %v1419_v14 }
  0x6a   :  { %828 = vmatpush.msra.mxu0 %v1751_v24 }
  0x6b   :  { %1295 = vmatpush.msk.msra.mxu1 %vm1594_vm5, %v1419_v14 }
  0x6c   :  { %831 = vmatpush.msra.mxu0 %v1790_v45 }
  0x6d   :  { %1296 = vmatpush.msk.msra.mxu1 %vm2324_vm9, %v1419_v14 }
  0x6e   :  { %834 = vmatpush.msra.mxu0 %v1804_v60 }
  0x6f   :  { %1297 = vmatpush.msk.msra.mxu1 %vm2325_vm2, %v1419_v14 }
  0x70   :  { %837 = vmatpush.msra.mxu0 %v1850_v36 }
  0x71   :  { %1298 = vmatpush.msk.msra.mxu1 %vm1675_vm14, %v1419_v14 }
  0x72   :  { %840 = vmatpush.msra.mxu0 %v1866_v20 }
  0x73   :  { %1299 = vmatpush.msk.msra.mxu1 %vm1702_vm7, %v1419_v14 }
  0x74   :  { %843 = vmatpush.msra.mxu0 %v1878_v58 }
  0x75   :  { %1300 = vmatpush.msk.msra.mxu1 %vm1724_vm13, %v1419_v14  ;;  %vm149_vm13 = vcmp.ge.s32.totalorder %v1453_v2, %v148_v27 }
  0x77   :  { %1301 = vmatpush.msk.msra.mxu1 %vm1774_vm11, %v1419_v14  ;;  %vm152_vm11 = vcmp.lt.s32.totalorder %v1453_v2, %v151_v31 }
  0x78   :  { %vm153_vm7 = vmand %vm149_vm13, %vm152_vm11  ;;  %vm2337_vm13 = vnez %v2305_v3  ;;  %vm2338_vm11 = vnez %v2308_v9 }
  0x79   :  { %1302 = vmatpush.msk.msra.mxu1 %vm1786_vm12, %v1419_v14  ;;  %v2078_v40 = vsel %vm153_vm7, 1.0, %v2326_v35  ;;  %vm2279_vm12 = vcmask 1043456   ;;  %vm2278_vm7 = vcmask 31744   ;;  %v2327_v35 = vld [vmem:[#allocation11_spill] sm:$0xff] }
  0x7a   :  { %v504_v44 = vsel %vm2279_vm12, %v2078_v40, 0  ;;  %1270 = vmatpush.msk.msrb.mxu2 %vm2279_vm12, %v2078_v40  ;;  %1321 = vmatpush.msk.msrb.mxu0 %vm2279_vm12, %v2078_v40 }
  0x7b   :  { %1303 = vmatpush.msk.msra.mxu1 %vm1827_vm8, %v1419_v14  ;;  %v2086_v1 = vsub.f32 %v504_v44, %v504_v44  ;;  %v2328_v44 = vld [vmem:[#allocation12_spill] sm:$0xff] }
  0x7d   :  { %1304 = vmatpush.msk.msra.mxu1 %vm1846_vm6, %v1419_v14  ;;  %v2089_v50 = vand.u32 4294901760, %v2086_v1  ;;  %575 = vmatpush.msra.mxu2 %v2086_v1 }
  0x7f   :  { %v550_v2 = vsub.f32 %v2086_v1, %v2089_v50 }
  0x81   :  { %v551_v54 = vand.u32 4294901760, %v550_v2  ;;  %v2329_v2 = vld [vmem:[#allocation13_spill] sm:$0xff] }
  0x83   :  { %552 = vmatpush.msrb.mxu3 %v551_v54  ;;  %1073 = vmatpush.msrb.mxu1 %v551_v54  ;;  %v2330_v54 = vld [vmem:[#allocation14_spill] sm:$0xff] }
  0x85   :  { %1271 = vmatpush.msk.msra.mxu3 %vm2279_vm12, %v2078_v40 }
  0xb4   :  { %v194_v8 = vpop.f32.mrf.mxu0 }
  0xb9   :  { %v388_v60 = vpop.f32.mrf.mxu3 }
  0xbb   :  { %v295_v63 = vpop.f32.mrf.mxu1 }
  0xbc   :  { %v296_v12 = vadd.f32 %v295_v63, %v194_v8  ;;  %v349_v24 = vpop.f32.mrf.mxu2  ;;  %v2331_v63 = vld [vmem:[#allocation15_spill] sm:$0xff]  ;;  %v2333_v8 = vld [vmem:[#allocation17_spill] sm:$0xff] }
  0xbe   :  { %v350_v45 = vadd.f32 %v349_v24, %v296_v12  ;;  %v2334_v12 = vld [vmem:[#allocation19_spill] sm:$0xff]  ;;  %v2335_v24 = vld [vmem:[#allocation20_spill] sm:$0xff] }
  0xc0   :  { %v389_v0 = vadd.f32 %v388_v60, %v350_v45  ;;  %v2336_v45 = vld [vmem:[#allocation21_spill] sm:$0xff] }
  0xd2   :  { %v457_v36 = vpop.f32.mrf.mxu0 }
  0xd3   :  { %v458_v47 = vadd.f32 %v457_v36, %v389_v0 }
  0xdb   :  { %v494_v4 = vpop.f32.mrf.mxu1 }
  0xdc   :  { %v495_v20 = vadd.f32 %v494_v4, %v458_v47 }
  0xde   :  { %v497_v58 = vmul.f32 0.03125, %v495_v20 }
  0xe0   :  { %v500_v11 = vsel %vm2278_vm7, %v497_v58, 0  ;;  %vm2339_vm7 = vnez %v2311_v37 }
  0xe1   :  { %v523_v32 = vand.u32 4294901760, %v500_v11 }
  0xe3   :  { %v524_v55 = vsub.f32 %v500_v11, %v523_v32  ;;  %554 = vmatmul.f32.vlgmr.msrb.gmra.mxu3 %v523_v32 }
  0xe4   :  { %1272 = vmatpush.msk.msrb.mxu3 %vm2279_vm12, %v2078_v40  ;;  %vm2340_vm12 = vnez %v2313_v42 }
  0xe5   :  { %v525_v22 = vand.u32 4294901760, %v524_v55 }
  0xe7   :  { %v526_v27 = vsub.f32 %v524_v55, %v525_v22 }
  0xe9   :  { %v527_v31 = vand.u32 4294901760, %v526_v27 }
  0xeb   :  { %528 = vmatmul.f32.vlgmr.msrb.gmra.mxu2 %v527_v31  ;;  %602 = vmatmul.f32.vlgmr.msra.gmra.mxu3 %v525_v22 }
  0xec   :  { %624 = vmatpush.msrb.mxu2 %v2089_v50  ;;  %700 = vmatpush.msra.mxu3 %v1620_v46  ;;  %v2332_v46 = vld [vmem:[#allocation16_spill] sm:$0xff] }
  0xee   :  { %706 = vmatpush.msra.mxu3 %v2327_v35 }
  0xf0   :  { %712 = vmatpush.msra.mxu3 %v2328_v44 }
  0xf2   :  { %718 = vmatpush.msra.mxu3 %v2329_v2 }
  0xf3   :  { %578 = vmatmul.f32.vlgmr.msra.gmra.mxu2 %v524_v55  ;;  %648 = vmatmul.f32.vlgmr.msrb.gmra.mxu3 %v523_v32 }
  0xf4   :  { %1273 = vmatpush.msk.msra.mxu2 %vm1478_vm10, %v1419_v14  ;;  %724 = vmatpush.msra.mxu3 %v2330_v54 }
  0xf6   :  { %1274 = vmatpush.msk.msra.mxu2 %vm1491_vm15, %v1419_v14  ;;  %730 = vmatpush.msra.mxu3 %v2331_v63 }
  0xf8   :  { %1275 = vmatpush.msk.msra.mxu2 %vm1508_vm0, %v1419_v14  ;;  %736 = vmatpush.msra.mxu3 %v2332_v46 }
  0xfa   :  { %1276 = vmatpush.msk.msra.mxu2 %vm1530_vm1, %v1419_v14  ;;  %742 = vmatpush.msra.mxu3 %v2333_v8 }
  0xfb   :  { %626 = vmatmul.f32.vlgmr.msrb.gmra.mxu2 %v523_v32 }
  0xfc   :  { %1277 = vmatpush.msk.msra.mxu2 %vm1551_vm3, %v1419_v14  ;;  %748 = vmatpush.msra.mxu3 %v2334_v12 }
  0xfe   :  { %1278 = vmatpush.msk.msra.mxu2 %vm1572_vm4, %v1419_v14  ;;  %754 = vmatpush.msra.mxu3 %v2335_v24 }
 0x100   :  { %1279 = vmatpush.msk.msra.mxu2 %vm1594_vm5, %v1419_v14  ;;  %760 = vmatpush.msra.mxu3 %v2336_v45 }
 0x102   :  { %1280 = vmatpush.msk.msra.mxu2 %vm2324_vm9, %v1419_v14  ;;  %766 = vmatpush.msra.mxu3 %v1901_v17 }
 0x104   :  { %1281 = vmatpush.msk.msra.mxu2 %vm2325_vm2, %v1419_v14  ;;  %772 = vmatpush.msra.mxu3 %v1916_v52 }
 0x106   :  { %1282 = vmatpush.msk.msra.mxu2 %vm1675_vm14, %v1419_v14  ;;  %778 = vmatpush.msra.mxu3 %v1928_v51 }
 0x108   :  { %1283 = vmatpush.msk.msra.mxu2 %vm2337_vm13, %v1419_v14  ;;  %784 = vmatpush.msra.mxu3 %v1935_v16 }
 0x10a   :  { %1284 = vmatpush.msk.msra.mxu2 %vm2338_vm11, %v1419_v14  ;;  %790 = vmatpush.msra.mxu3 %v1940_v61 }
 0x10c   :  { %1305 = vmatpush.msk.msrb.mxu3 %vm1478_vm10, %v1419_v14  ;;  %1285 = vmatpush.msk.msra.mxu2 %vm2339_vm7, %v1419_v14  ;;  %vm2342_vm10 = vcmask 1043456  }
 0x10e   :  { %1306 = vmatpush.msk.msrb.mxu3 %vm1491_vm15, %v1419_v14  ;;  %1286 = vmatpush.msk.msra.mxu2 %vm2340_vm12, %v1419_v14 }
 0x110   :  { %1307 = vmatpush.msk.msrb.mxu3 %vm1508_vm0, %v1419_v14  ;;  %1287 = vmatpush.msk.msra.mxu2 %vm1827_vm8, %v1419_v14 }
 0x112   :  { %1308 = vmatpush.msk.msrb.mxu3 %vm1530_vm1, %v1419_v14  ;;  %1288 = vmatpush.msk.msra.mxu2 %vm1846_vm6, %v1419_v14 }
 0x114   :  { %892 = vmatpush.msrb.mxu2 %v1545_v29  ;;  %1309 = vmatpush.msk.msrb.mxu3 %vm1551_vm3, %v1419_v14 }
 0x116   :  { %896 = vmatpush.msrb.mxu2 %v1566_v33  ;;  %1310 = vmatpush.msk.msrb.mxu3 %vm1572_vm4, %v1419_v14 }
 0x118   :  { %900 = vmatpush.msrb.mxu2 %v1588_v38  ;;  %1311 = vmatpush.msk.msrb.mxu3 %vm1594_vm5, %v1419_v14 }
 0x11a   :  { %904 = vmatpush.msrb.mxu2 %v1610_v43  ;;  %1312 = vmatpush.msk.msrb.mxu3 %vm2324_vm9, %v1419_v14 }
 0x11c   :  { %908 = vmatpush.msrb.mxu2 %v1625_v48  ;;  %1313 = vmatpush.msk.msrb.mxu3 %vm2325_vm2, %v1419_v14 }
 0x11e   :  { %912 = vmatpush.msrb.mxu2 %v1646_v53  ;;  %1314 = vmatpush.msk.msrb.mxu3 %vm1675_vm14, %v1419_v14  ;;  %vm2344_vm14 = vmmov %vm2342_vm10 }
 0x120   :  { %916 = vmatpush.msrb.mxu2 %v1666_v57  ;;  %1315 = vmatpush.msk.msrb.mxu3 %vm2337_vm13, %v1419_v14 }
 0x122   :  { %920 = vmatpush.msrb.mxu2 %v1720_v7  ;;  %1316 = vmatpush.msk.msrb.mxu3 %vm2338_vm11, %v1419_v14 }
 0x124   :  { %924 = vmatpush.msrb.mxu2 %v1749_v23  ;;  %1317 = vmatpush.msk.msrb.mxu3 %vm2339_vm7, %v1419_v14 }
 0x126   :  { %928 = vmatpush.msrb.mxu2 %v1761_v28  ;;  %1318 = vmatpush.msk.msrb.mxu3 %vm2340_vm12, %v1419_v14  ;;  %vm2343_vm12 = vcmask 31744  }
 0x128   :  { %932 = vmatpush.msrb.mxu2 %v1779_v41  ;;  %1319 = vmatpush.msk.msrb.mxu3 %vm1827_vm8, %v1419_v14 }
 0x12a   :  { %936 = vmatpush.msrb.mxu2 %v1817_v10  ;;  %1320 = vmatpush.msk.msrb.mxu3 %vm1846_vm6, %v1419_v14  ;;  %v2341_v14 = vld [vmem:[#allocation18_spill] sm:$0xff] }
 0x12c   :  { %940 = vmatpush.msrb.mxu2 %v1832_v19 }
 0x12e   :  { %944 = vmatpush.msrb.mxu2 %v1876_v6 }
 0x130   :  { %948 = vmatpush.msrb.mxu2 %v1891_v62 }
 0x132   :  { %952 = vmatpush.msrb.mxu2 %v1906_v5 }
 0x166   :  { %v555_v13 = vpop.f32.mrf.mxu3 }
 0x16e   :  { %v529_v15 = vpop.f32.mrf.mxu2  ;;  %v603_v16 = vpop.f32.mrf.mxu3 }
 0x16f   :  { %v556_v26 = vadd.f32 %v555_v13, %v529_v15 }
 0x176   :  { %v579_v21 = vpop.f32.mrf.mxu2  ;;  %v649_v38 = vpop.f32.mrf.mxu3 }
 0x177   :  { %v580_v29 = vadd.f32 %v579_v21, %v556_v26 }
 0x179   :  { %v604_v30 = vadd.f32 %v603_v16, %v580_v29 }
 0x17e   :  { %v627_v33 = vpop.f32.mrf.mxu2 }
 0x17f   :  { %v628_v34 = vadd.f32 %v627_v33, %v604_v30  ;;  %v1331_v33 = vld [vmem:[#allocation5] ss:$0 sm:$0xff] }
 0x181   :  { %v650_v39 = vadd.f32 %v649_v38, %v628_v34 }
 0x183   :  { %v2229_v43 = vsub.f32 %v2341_v14, %v650_v39 }
 0x185   :  { %v653_v48 = vmul.f32 %v2229_v43, %v2229_v43 }
 0x187   :  { %v686_v49 = vand.u32 4294901760, %v653_v48 }
 0x189   :  { %792 = vmatmul.f32.vlgmr.msra.gmra.mxu3 %v686_v49  ;;  %v687_v51 = vsub.f32 %v653_v48, %v686_v49 }
 0x18b   :  { %846 = vmatmul.f32.vlgmr.msra.gmra.mxu0 %v687_v51  ;;  %v688_v53 = vand.u32 4294901760, %v687_v51 }
 0x18c   :  { %1096 = vmatpush.msra.mxu0 %v2086_v1 }
 0x18d   :  { %885 = vmatmul.f32.vlgmr.msra.gmra.mxu1 %v688_v53  ;;  %v689_v56 = vsub.f32 %v687_v51, %v688_v53 }
 0x18e   :  { %1322 = vmatpush.msk.msra.mxu1 %vm2342_vm10, %v2078_v40 }
 0x18f   :  { %v690_v57 = vand.u32 4294901760, %v689_v56 }
 0x191   :  { %691 = vmatmul.f32.vlgmr.msra.gmra.mxu2 %v690_v57  ;;  %991 = vmatmul.f32.vlgmr.msrb.gmra.mxu3 %v686_v49 }
 0x199   :  { %954 = vmatmul.f32.vlgmr.msrb.gmra.mxu2 %v686_v49 }
 0x208   :  { %v847_v6 = vpop.f32.mrf.mxu0 }
 0x20a   :  { %v886_v9 = vpop.f32.mrf.mxu1 }
 0x20c   :  { %v793_v59 = vpop.f32.mrf.mxu3 }
 0x214   :  { %v692_v62 = vpop.f32.mrf.mxu2  ;;  %v992_v41 = vpop.f32.mrf.mxu3 }
 0x215   :  { %v794_v3 = vadd.f32 %v793_v59, %v692_v62 }
 0x217   :  { %v848_v7 = vadd.f32 %v847_v6, %v794_v3 }
 0x219   :  { %v887_v23 = vadd.f32 %v886_v9, %v848_v7 }
 0x21c   :  { %v955_v28 = vpop.f32.mrf.mxu2 }
 0x21d   :  { %v956_v37 = vadd.f32 %v955_v28, %v887_v23 }
 0x21f   :  { %v993_v42 = vadd.f32 %v992_v41, %v956_v37 }
 0x221   :  { %v995_v5 = vmul.f32 0.032258064, %v993_v42 }
 0x223   :  { %v996_v10 = vadd.f32 1e-06, %v995_v5 }
 0x225   :  { %1333 = vrsqrt.f32 %v996_v10  ;;  %vm1004_vm15 = vcmp.eq.f32.partialorder %v996_v10, inf  ;;  %v1007_v60 = vand.u32 2147483648, %v996_v10  ;;  %vm1006_vm0 = vcmp.eq.f32.partialorder %v996_v10, 0.0 }
 0x22b   :  { %v1334_v18 = vpop.eup %1333 }
 0x22c   :  { %v998_v19 = vmul.f32 %v1334_v18, %v996_v10 }
 0x22e   :  { %v999_v25 = vmul.f32 %v1334_v18, %v998_v19 }
 0x230   :  { %v1000_v17 = vmul.f32 0.5, %v999_v25 }
 0x232   :  { %v1001_v52 = vsub.f32 1.5, %v1000_v17 }
 0x234   :  { %v1002_v61 = vmul.f32 %v1334_v18, %v1001_v52 }
 0x236   :  { %v1003_v1 = vmul.f32 %v1002_v61, %v996_v10 }
 0x238   :  { %v1005_v0 = vsel %vm1004_vm15, %v996_v10, %v1003_v1 }
 0x239   :  { %v1008_v36 = vsel %vm1006_vm0, %v1007_v60, %v1005_v0 }
 0x23a   :  { %v1009_v47 = vadd.f32 1e-06, %v1008_v36 }
 0x23c   :  { %1335 = vrcp.f32 %v1009_v47  ;;  %v1021_v11 = vand.u32 2147483648, %v1009_v47  ;;  %v1019_v55 = vand.u32 2147483647, %v1009_v47  ;;  %vm1015_vm3 = vweird.f32 %v1009_v47 }
 0x23e   :  { %v1022_v27 = vor.u32 1.1754944e-38, %v1021_v11  ;;  %vm1020_vm5 = vcmp.eq.f32.partialorder %v1019_v55, 8.507059e+37 }
 0x242   :  { %v1336_v4 = vpop.eup %1335 }
 0x243   :  { %v1011_v20 = vmul.f32 %v1336_v4, %v1009_v47  ;;  %vm1016_vm1 = vweird.f32 %v1336_v4 }
 0x244   :  { %vm1017_vm4 = vmor %vm1015_vm3, %vm1016_vm1 }
 0x245   :  { %v1012_v58 = vsub.f32 1.0, %v1011_v20 }
 0x247   :  { %v1013_v32 = vmul.f32 %v1336_v4, %v1012_v58 }
 0x249   :  { %v1014_v22 = vadd.f32 %v1336_v4, %v1013_v32 }
 0x24b   :  { %v1018_v31 = vsel %vm1017_vm4, %v1336_v4, %v1014_v22 }
 0x24c   :  { %v1023_v35 = vsel %vm1020_vm5, %v1022_v27, %v1018_v31 }
 0x24d   :  { %v1025_v44 = vsel %vm2343_vm12, %v1023_v35, 0 }
 0x24e   :  { %v1044_v2 = vand.u32 4294901760, %v1025_v44 }
 0x250   :  { %v1045_v54 = vsub.f32 %v1025_v44, %v1044_v2  ;;  %1075 = vmatmul.f32.vlgmr.msrb.gmra.mxu1 %v1044_v2 }
 0x251   :  { %1323 = vmatpush.msk.msrb.mxu1 %vm2344_vm14, %v2078_v40 }
 0x252   :  { %v1046_v63 = vand.u32 4294901760, %v1045_v54 }
 0x254   :  { %v1047_v46 = vsub.f32 %v1045_v54, %v1046_v63 }
 0x256   :  { %v1048_v8 = vand.u32 4294901760, %v1047_v46 }
 0x258   :  { %1049 = vmatmul.f32.vlgmr.msrb.gmra.mxu0 %v1048_v8  ;;  %1123 = vmatmul.f32.vlgmr.msra.gmra.mxu1 %v1046_v63 }
 0x259   :  { %1145 = vmatpush.msrb.mxu0 %v2089_v50  ;;  %v1332_v50 = vld [vmem:[%s2252_s2] ss:$0 sm:$0xff] }
 0x260   :  { %1099 = vmatmul.f32.vlgmr.msra.gmra.mxu0 %v1045_v54  ;;  %1169 = vmatmul.f32.vlgmr.msrb.gmra.mxu1 %v1044_v2 }
 0x268   :  { %1147 = vmatmul.f32.vlgmr.msrb.gmra.mxu0 %v1044_v2 }
 0x2cd   :  { %v1076_v12 = vpop.f32.mrf.mxu1 }
 0x2d5   :  { %v1050_v24 = vpop.f32.mrf.mxu0  ;;  %v1124_v45 = vpop.f32.mrf.mxu1 }
 0x2d6   :  { %v1077_v15 = vadd.f32 %v1076_v12, %v1050_v24 }
 0x2dd   :  { %v1100_v13 = vpop.f32.mrf.mxu0  ;;  %v1170_v40 = vpop.f32.mrf.mxu1 }
 0x2de   :  { %v1101_v16 = vadd.f32 %v1100_v13, %v1077_v15 }
 0x2e0   :  { %v1125_v21 = vadd.f32 %v1124_v45, %v1101_v16 }
 0x2e5   :  { %v1148_v26 = vpop.f32.mrf.mxu0 }
 0x2e6   :  { %v1149_v29 = vadd.f32 %v1148_v26, %v1125_v21 }
 0x2e8   :  { %v1171_v30 = vadd.f32 %v1170_v40, %v1149_v29 }
 0x2ea   :  { %v1173_v34 = vmul.f32 %v1171_v30, %v2229_v43 }
 0x2ec   :  { %v1178_v38 = vmul.f32 %v1331_v33, %v1173_v34 }
 0x2ee   :  { %v1183_v39 = vadd.f32 %v1332_v50, %v1178_v38 }
 0x2f0   :  { %1184 = vst [vmem:[#allocation7] sm:$0xff] %v1183_v39 }
 0x2f1   :  { %1188 = vsyncadd [#allocation4], 64  ;;  %s1191_s26 = sshll.u32 %s2253_s3, 4  ;;  %s1421_s27 = smov [#allocation7]   ;;  %s1192_s26 = int_to_ptr.hbm [resolvable:$true] %s1191_s26 }
 0x2f2   :  { %s1189_s28 = sshll.u32 %s1421_s27, 4  ;;  %s1190_s28 = int_to_ptr.vmem [resolvable:$true] %s1189_s28 }
 0x2f3   :  { %1197 = dma.vmem_to_hbm [thread:$0]  %s1190_s28, 64, %s1192_s26, [#allocation4], %s1416_s20, %s1416_s20, %s1417_s21  }
 0x2f4   :  { %1413 = dma.done.wait [#allocation4], 128  }
 0x2f5   :  { %1414 = vsyncadd [#allocation4], 4294967168 }
 0x2f6   :  { %1202 = vsyncpa [#allocation3], 1 }
 0x2f7   :  { %1203 = vsyncpa [#allocation6], 1 }
 0x2f8   :  { %1204 = vsyncpa [#allocation4], 1 }

</bundles_post_ra>
